<compile_context>
chip_gen: v7x
topology: tpu7x:2x2x1
jax: 0.10.0
libtpu: 0.0.40
codegen_flags: <defaults>
</compile_context>

<pallas_src>
import functools

import jax
import jax.numpy as jnp
from jax import lax
from jax.experimental import pallas as pl
from jax.experimental.pallas import tpu as pltpu

_EPS = 1e-12            # torch.nn.functional.normalize default eps
_EPS_SQ = _EPS * _EPS
_NEG = -1e30            # mask value for padded key columns (finite -> no NaN)


def _round_up(x, m):
    return (x + m - 1) // m * m


def _l2_normalize_f32(x):
    """F.normalize(dim=-1) in f32: x / max(||x||, eps), via rsqrt."""
    sq = jnp.sum(x * x, axis=-1, keepdims=True)
    return x * lax.rsqrt(jnp.maximum(sq, _EPS_SQ))


def _pad_rows(x, rows):
    if x.shape[0] == rows:
        return x
    pad = [(0, rows - x.shape[0])] + [(0, 0)] * (x.ndim - 1)
    return jnp.pad(x, pad)


def _pick_tq(n):
    # 256 fills the 256-wide MXU (v6e/v7x) and halves key re-streaming; only
    # use it when >= 2 query tiles remain so the "parallel" axis still spans
    # both TensorCores on v7x.  Otherwise 128 (v5e MXU width) or a multiple of
    # 16 (bf16 sublane packing) for small N.
    if _round_up(n, 256) // 256 >= 2:
        return 256
    return min(128, _round_up(n, 16))


@functools.lru_cache(maxsize=None)
def _vmem_limit_bytes():
    cap = 64 * 1024 * 1024          # conservative fallback (v7x physical VMEM)
    try:
        cap = int(pltpu.get_tpu_info().vmem_capacity_bytes)
    except Exception:               # interpret mode / older runtimes
        pass
    return int(min(100 * 1024 * 1024, cap * 3 // 4))


@functools.lru_cache(maxsize=None)
def _compiler_params():
    return pltpu.CompilerParams(
        dimension_semantics=("parallel", "arbitrary"),   # query tiles // key tiles
        vmem_limit_bytes=_vmem_limit_bytes())


# --------------------------------------------------------------------------
# Kernels
# --------------------------------------------------------------------------
def _flash_kernel(q_ref, pos_ref, k_ref, loss_ref, m_s, l_s, *,
                  num_keys, tk, self_mode, mask_needed):
    """Self / unpaired mode: online LSE over pre-normalized bf16 key tiles.

    q_ref  : (TQ, D)  bf16, pre-normalized, 1/T folded in.
    pos_ref: (TQ, 1)  f32 positive logit (already scaled by 1/T).
    k_ref  : (TK, D)  bf16, pre-normalized key / negative tile.
    self_mode=True : the positive logit arrives via the key stream (diagonal),
                     so (m, l) start empty.
    self_mode=False: the positive logit is a separate column, seeded into
                     (m, l) at init.
    """
    ki = pl.program_id(1)

    @pl.when(ki == 0)
    def _init():
        if self_mode:
            m_s[...] = jnp.full_like(m_s, _NEG)
            l_s[...] = jnp.zeros_like(l_s)
        else:
            m_s[...] = pos_ref[...]
            l_s[...] = jnp.ones_like(l_s)

    # (TQ, TK) similarity tile: bf16 operands, f32 MXU accumulation.
    s = lax.dot_general(q_ref[...], k_ref[...], (((1,), (1,)), ((), ())),
                        preferred_element_type=jnp.float32)

    if mask_needed:
        # Only emitted when the key count is not tile-aligned (trace-time skip
        # otherwise); padded key columns get a finite very-negative logit.
        col = ki * tk + lax.broadcasted_iota(jnp.int32, s.shape, 1)
        s = jnp.where(col < num_keys, s, _NEG)

    # Online log-sum-exp update (f32).
    m_new = jnp.maximum(m_s[...], jnp.max(s, axis=-1, keepdims=True))
    alpha = jnp.exp(m_s[...] - m_new)
    l_s[...] = alpha * l_s[...] + jnp.sum(jnp.exp(s - m_new), axis=-1,
                                          keepdims=True)
    m_s[...] = m_new

    @pl.when(ki == pl.num_programs(1) - 1)
    def _finalize():
        loss_ref[...] = m_s[...] + jnp.log(l_s[...]) - pos_ref[...]


def _paired_kernel(q_ref, pos_ref, n_ref, loss_ref, m_s, l_s, *,
                   num_neg, tm, mask_needed):
    """Paired mode: each query has its own negatives.

    q_ref  : (TQ, 1, D)   bf16, pre-normalized, 1/T folded in.
    pos_ref: (TQ, 1, 1)   f32 positive logit (already scaled).
    n_ref  : (TQ, TM, D)  bf16, pre-normalized negatives tile.
    The contraction is a batched MXU matmul (per-query (1,D)x(D,TM)); the
    (TQ,TM,D) f32 product is never materialized.
    """
    mi = pl.program_id(1)

    @pl.when(mi == 0)
    def _init():
        m_s[...] = pos_ref[...]
        l_s[...] = jnp.ones_like(l_s)

    # (TQ, 1, TM): batch dim = query, contract D, f32 accumulation.
    s = lax.dot_general(q_ref[...], n_ref[...],
                        dimension_numbers=(((2,), (2,)), ((0,), (0,))),
                        preferred_element_type=jnp.float32)

    if mask_needed:
        col = mi * tm + lax.broadcasted_iota(jnp.int32, s.shape, 2)
        s = jnp.where(col < num_neg, s, _NEG)

    m_new = jnp.maximum(m_s[...], jnp.max(s, axis=-1, keepdims=True))
    alpha = jnp.exp(m_s[...] - m_new)
    l_s[...] = alpha * l_s[...] + jnp.sum(jnp.exp(s - m_new), axis=-1,
                                          keepdims=True)
    m_s[...] = m_new

    @pl.when(mi == pl.num_programs(1) - 1)
    def _finalize():
        loss_ref[...] = m_s[...] + jnp.log(l_s[...]) - pos_ref[...]


# --------------------------------------------------------------------------
# pallas_call wrappers
# --------------------------------------------------------------------------
def _per_sample_flash(query, positive, negative_keys, *, temperature, self_mode):
    n, d = query.shape
    inv_t = 1.0 / float(temperature)

    # Normalize once in the wrapper; fold 1/T into the bf16 query operand.
    qn = _l2_normalize_f32(query.astype(jnp.float32))
    pn = _l2_normalize_f32(positive.astype(jnp.float32))
    pos = jnp.sum(qn * pn, axis=-1, keepdims=True) * inv_t          # (N,1) f32
    qs = (qn * inv_t).astype(jnp.bfloat16)

    if self_mode:
        keys_n = pn                       # keys are the positive embeddings
    else:
        keys_n = _l2_normalize_f32(negative_keys.astype(jnp.float32))
    num_keys = keys_n.shape[0]

    tq = _pick_tq(n)
    tk = min(1024, _round_up(num_keys, 128))     # lane-dense score tile
    n_pad = _round_up(n, tq)
    k_pad = _round_up(num_keys, tk)

    qs = _pad_rows(qs, n_pad)
    pos = _pad_rows(pos, n_pad)
    kb = _pad_rows(keys_n.astype(jnp.bfloat16), k_pad)   # normalize+cast+pad fused

    kernel = functools.partial(_flash_kernel, num_keys=num_keys, tk=tk,
                               self_mode=self_mode,
                               mask_needed=(k_pad != num_keys))
    loss = pl.pallas_call(
        kernel,
        out_shape=jax.ShapeDtypeStruct((n_pad, 1), jnp.float32),
        grid_spec=pltpu.PrefetchScalarGridSpec(
            num_scalar_prefetch=0,
            grid=(n_pad // tq, k_pad // tk),
            in_specs=[pl.BlockSpec((tq, d), lambda qi, ki: (qi, 0)),
                      pl.BlockSpec((tq, 1), lambda qi, ki: (qi, 0)),
                      pl.BlockSpec((tk, d), lambda qi, ki: (ki, 0))],
            out_specs=pl.BlockSpec((tq, 1), lambda qi, ki: (qi, 0)),
            scratch_shapes=[pltpu.VMEM((tq, 1), jnp.float32),   # running max
                            pltpu.VMEM((tq, 1), jnp.float32)]), # running sumexp
        compiler_params=_compiler_params(),
    )(qs, pos, kb)
    return loss[:n, 0]


def _per_sample_paired(query, positive, negatives, *, temperature):
    n, d = query.shape
    m = negatives.shape[1]
    inv_t = 1.0 / float(temperature)

    qn = _l2_normalize_f32(query.astype(jnp.float32))
    pn = _l2_normalize_f32(positive.astype(jnp.float32))
    pos = jnp.sum(qn * pn, axis=-1, keepdims=True) * inv_t
    qs = (qn * inv_t).astype(jnp.bfloat16)
    nb = _l2_normalize_f32(negatives.astype(jnp.float32)).astype(jnp.bfloat16)

    tq = min(32, _round_up(n, 8))
    tm = min(128, _round_up(m, 16))
    n_pad = _round_up(n, tq)
    m_pad = _round_up(m, tm)

    qs3 = _pad_rows(qs, n_pad)[:, None, :]           # (N_pad, 1, D) bf16
    pos3 = _pad_rows(pos, n_pad)[:, :, None]         # (N_pad, 1, 1) f32
    nb = jnp.pad(nb, ((0, n_pad - n), (0, m_pad - m), (0, 0)))

    kernel = functools.partial(_paired_kernel, num_neg=m, tm=tm,
                               mask_needed=(m_pad != m))
    loss = pl.pallas_call(
        kernel,
        out_shape=jax.ShapeDtypeStruct((n_pad, 1, 1), jnp.float32),
        grid_spec=pltpu.PrefetchScalarGridSpec(
            num_scalar_prefetch=0,
            grid=(n_pad // tq, m_pad // tm),
            in_specs=[pl.BlockSpec((tq, 1, d), lambda qi, mi: (qi, 0, 0)),
                      pl.BlockSpec((tq, 1, 1), lambda qi, mi: (qi, 0, 0)),
                      pl.BlockSpec((tq, tm, d), lambda qi, mi: (qi, mi, 0))],
            out_specs=pl.BlockSpec((tq, 1, 1), lambda qi, mi: (qi, 0, 0)),
            scratch_shapes=[pltpu.VMEM((tq, 1, 1), jnp.float32),
                            pltpu.VMEM((tq, 1, 1), jnp.float32)]),
        compiler_params=_compiler_params(),
    )(qs3, pos3, nb)
    return loss[:n, 0, 0]


# --------------------------------------------------------------------------
# Module-style wrapper (forward only)
# --------------------------------------------------------------------------
class InfoNCE:
    """JAX/Pallas port of the PyTorch InfoNCE module (forward only)."""

    def __init__(self, temperature=0.1, reduction="mean",
                 negative_mode="unpaired", ignore_index=0):
        self.temperature = float(temperature)
        self.reduction = reduction
        self.negative_mode = negative_mode
        self.ignore_index = ignore_index  # unused by the reference forward

    def __call__(self, query, positive_key, negative_keys=None):
        if query.ndim != 2:
            raise ValueError("<query> must have 2 dimensions.")
        if positive_key.ndim != 2:
            raise ValueError("<positive_key> must have 2 dimensions.")
        if negative_keys is not None:
            if self.negative_mode == "unpaired" and negative_keys.ndim != 2:
                raise ValueError("unpaired <negative_keys> must be 2-D.")
            if self.negative_mode == "paired" and negative_keys.ndim != 3:
                raise ValueError("paired <negative_keys> must be 3-D.")
        if query.shape[0] != positive_key.shape[0]:
            raise ValueError("<query> and <positive_key> must have the same N.")
        if (negative_keys is not None and self.negative_mode == "paired"
                and query.shape[0] != negative_keys.shape[0]):
            raise ValueError("paired <negative_keys> must have the same N as <query>.")
        if query.shape[-1] != positive_key.shape[-1]:
            raise ValueError("<query> and <positive_key> must have the same D.")
        if negative_keys is not None and query.shape[-1] != negative_keys.shape[-1]:
            raise ValueError("<query> and <negative_keys> must have the same D.")
        if self.reduction not in ("none", "sum", "mean"):
            raise ValueError(f"unknown reduction {self.reduction!r}")

        if negative_keys is None:
            per_sample = _per_sample_flash(query, positive_key, None,
                                           temperature=self.temperature,
                                           self_mode=True)
        elif self.negative_mode == "unpaired":
            per_sample = _per_sample_flash(query, positive_key, negative_keys,
                                           temperature=self.temperature,
                                           self_mode=False)
        elif self.negative_mode == "paired":
            per_sample = _per_sample_paired(query, positive_key, negative_keys,
                                            temperature=self.temperature)
        else:
            raise ValueError(f"unknown negative_mode {self.negative_mode!r}")

        if self.reduction == "mean":
            return jnp.mean(per_sample)
        if self.reduction == "sum":
            return jnp.sum(per_sample)
        return per_sample                      # reduction == 'none'


# ---------------- pure-JAX reference for sanity checking ----------------
def _ref_per_sample(q, p, n=None, temperature=0.1, negative_mode="unpaired"):
    def norm(x):
        return x / jnp.maximum(jnp.linalg.norm(x, axis=-1, keepdims=True), _EPS)

    q, p = norm(q), norm(p)
    if n is None:
        logits = q @ p.T
        labels = jnp.arange(q.shape[0])
    else:
        n = norm(n)
        pos = jnp.sum(q * p, axis=-1, keepdims=True)
        if negative_mode == "unpaired":
            neg = q @ n.T
        else:
            neg = jnp.einsum("nd,nmd->nm", q, n)
        logits = jnp.concatenate([pos, neg], axis=1)
        labels = jnp.zeros(q.shape[0], dtype=jnp.int32)
    logits = logits / temperature
    lse = jax.scipy.special.logsumexp(logits, axis=-1)
    picked = jnp.take_along_axis(logits, labels[:, None], axis=-1)[:, 0]
    return lse - picked


if __name__ == "__main__":
    key = jax.random.PRNGKey(0)
    kq, kp, kn, knp = jax.random.split(key, 4)
    # Deliberately non-tile-aligned shapes to exercise the padding/masking path.
    N, M, D = 10, 20, 32
    query = jax.random.normal(kq, (N, D), dtype=jnp.float32)
    positive = jax.random.normal(kp, (N, D), dtype=jnp.float32)
    negatives = jax.random.normal(kn, (M, D), dtype=jnp.float32)
    paired_neg = jax.random.normal(knp, (N, M, D), dtype=jnp.float32)

    loss_u = InfoNCE(temperature=0.1, reduction="mean", negative_mode="unpaired")
    loss_p = InfoNCE(temperature=0.1, reduction="mean", negative_mode="paired")
    loss_none = InfoNCE(temperature=0.1, reduction="none", negative_mode="unpaired")

    out_unpaired = jax.block_until_ready(loss_u(query, positive, negatives))
    out_self = jax.block_until_ready(loss_u(query, positive))
    out_paired = jax.block_until_ready(loss_p(query, positive, paired_neg))
    out_none = jax.block_until_ready(loss_none(query, positive, negatives))

    ref_unpaired = jnp.mean(_ref_per_sample(query, positive, negatives))
    ref_self = jnp.mean(_ref_per_sample(query, positive, None))
    ref_paired = jnp.mean(_ref_per_sample(query, positive, paired_neg,
                                          negative_mode="paired"))
    ref_none = _ref_per_sample(query, positive, negatives)

    # bf16 MXU operands (f32 accumulation) everywhere -> ~5e-2 tolerance.
    assert jnp.allclose(out_unpaired, ref_unpaired, atol=5e-2, rtol=5e-2)
    assert jnp.allclose(out_self, ref_self, atol=5e-2, rtol=5e-2)
    assert out_none.shape == (N,)
    assert jnp.allclose(out_none, ref_none, atol=5e-2, rtol=5e-2)
    assert jnp.allclose(out_paired, ref_paired, atol=5e-2, rtol=5e-2)

    print("KERNEL_OK")
</pallas_src>

<mosaic_0001>
module attributes {stable_mosaic.version = 11 : i64} {
  func.func @_flash_kernel(%arg0: i32, %arg1: i32, %arg2: memref<16x32xbf16, #tpu.memory_space<vmem>>, %arg3: memref<16x1xf32, #tpu.memory_space<vmem>>, %arg4: memref<128x32xbf16, #tpu.memory_space<vmem>>, %arg5: memref<16x1xf32, #tpu.memory_space<vmem>>, %arg6: memref<16x1xf32, #tpu.memory_space<vmem>>, %arg7: memref<16x1xf32, #tpu.memory_space<vmem>>) attributes {dimension_semantics = [#tpu.dimension_semantics<parallel>, #tpu.dimension_semantics<arbitrary>], iteration_bounds = array<i64: 1, 1>, scalar_prefetch = 0 : i64, scratch_operands = 2 : i64, tpu.core_type = #tpu.core_type<tc>, window_params = [{transform_indices = @transform_0, window_bounds = array<i64: 16, 32>}, {transform_indices = @transform_1, window_bounds = array<i64: 16, 1>}, {transform_indices = @transform_2, window_bounds = array<i64: 128, 32>}, {transform_indices = @transform_3, window_bounds = array<i64: 16, 1>}]} {
    %c0_i32 = arith.constant 0 : i32
    %0 = arith.cmpi eq, %arg1, %c0_i32 : i32
    %1 = arith.extui %0 : i1 to i32
    %c0_i32_0 = arith.constant 0 : i32
    %2 = arith.cmpi ne, %1, %c0_i32_0 : i32
    scf.if %2 {
      %c0_19 = arith.constant 0 : index
      %c0_20 = arith.constant 0 : index
      %34 = vector.load %arg3[%c0_19, %c0_20] : memref<16x1xf32, #tpu.memory_space<vmem>>, vector<16x1xf32>
      %c0_21 = arith.constant 0 : index
      %c0_22 = arith.constant 0 : index
      %35 = vector.load %arg6[%c0_21, %c0_22] : memref<16x1xf32, #tpu.memory_space<vmem>>, vector<16x1xf32>
      tpu.vector_store %arg6[%c0_21, %c0_22], %34 {strides = array<i32>} : memref<16x1xf32, #tpu.memory_space<vmem>>, vector<16x1xf32>,
      %cst_23 = arith.constant 1.000000e+00 : f32
      %36 = vector.broadcast %cst_23 : f32 to vector<16x1xf32>
      %c0_24 = arith.constant 0 : index
      %c0_25 = arith.constant 0 : index
      %37 = vector.load %arg7[%c0_24, %c0_25] : memref<16x1xf32, #tpu.memory_space<vmem>>, vector<16x1xf32>
      tpu.vector_store %arg7[%c0_24, %c0_25], %36 {strides = array<i32>} : memref<16x1xf32, #tpu.memory_space<vmem>>, vector<16x1xf32>,
    } else {
    }
    %c0 = arith.constant 0 : index
    %c0_1 = arith.constant 0 : index
    %3 = vector.load %arg2[%c0, %c0_1] : memref<16x32xbf16, #tpu.memory_space<vmem>>, vector<16x32xbf16>
    %c0_2 = arith.constant 0 : index
    %c0_3 = arith.constant 0 : index
    %4 = vector.load %arg4[%c0_2, %c0_3] : memref<128x32xbf16, #tpu.memory_space<vmem>>, vector<128x32xbf16>
    %cst = arith.constant dense<0.000000e+00> : vector<16x128xf32>
    %5 = tpu.matmul %3, %4, %cst {dimension_numbers = #tpu.dot_dimension_numbers<[1], [1], [0], [0], [0, 0, 1, 0], [], []>} : vector<16x32xbf16>, vector<128x32xbf16>, vector<16x128xf32> -> vector<16x128xf32>
    %c128_i32 = arith.constant 128 : i32
    %6 = arith.muli %arg1, %c128_i32 : i32
    %7 = tpu.iota {dimensions = array<i32: 1>} : vector<16x128xi32>
    %8 = vector.broadcast %6 : i32 to vector<16x128xi32>
    %9 = arith.addi %8, %7 : vector<16x128xi32>
    %c20_i32 = arith.constant 20 : i32
    %10 = vector.broadcast %c20_i32 : i32 to vector<16x128xi32>
    %11 = arith.cmpi slt, %9, %10 : vector<16x128xi32>
    %cst_4 = arith.constant -1.000000e+30 : f32
    %12 = vector.broadcast %cst_4 : f32 to vector<16x128xf32>
    %13 = arith.select %11, %5, %12 : vector<16x128xi1>, vector<16x128xf32>
    %c0_5 = arith.constant 0 : index
    %c0_6 = arith.constant 0 : index
    %14 = vector.load %arg6[%c0_5, %c0_6] : memref<16x1xf32, #tpu.memory_space<vmem>>, vector<16x1xf32>
    %cst_7 = arith.constant dense<0xFF800000> : vector<16xf32>
    %15 = vector.multi_reduction <maximumf>, %13, %cst_7 [1] : vector<16x128xf32> to vector<16xf32>
    %16 = vector.shape_cast %15 : vector<16xf32> to vector<16x1xf32>
    %17 = arith.maximumf %14, %16 : vector<16x1xf32>
    %c0_8 = arith.constant 0 : index
    %c0_9 = arith.constant 0 : index
    %18 = vector.load %arg6[%c0_8, %c0_9] : memref<16x1xf32, #tpu.memory_space<vmem>>, vector<16x1xf32>
    %19 = arith.subf %18, %17 : vector<16x1xf32>
    %20 = math.exp %19 : vector<16x1xf32>
    %c0_10 = arith.constant 0 : index
    %c0_11 = arith.constant 0 : index
    %21 = vector.load %arg7[%c0_10, %c0_11] : memref<16x1xf32, #tpu.memory_space<vmem>>, vector<16x1xf32>
    %22 = arith.mulf %20, %21 : vector<16x1xf32>
    %23 = vector.broadcast %17 : vector<16x1xf32> to vector<16x128xf32>
    %24 = arith.subf %13, %23 : vector<16x128xf32>
    %25 = math.exp %24 : vector<16x128xf32>
    %cst_12 = arith.constant dense<0.000000e+00> : vector<16xf32>
    %26 = vector.multi_reduction <add>, %25, %cst_12 [1] : vector<16x128xf32> to vector<16xf32>
    %27 = vector.shape_cast %26 : vector<16xf32> to vector<16x1xf32>
    %28 = arith.addf %22, %27 : vector<16x1xf32>
    %c0_13 = arith.constant 0 : index
    %c0_14 = arith.constant 0 : index
    %29 = vector.load %arg7[%c0_13, %c0_14] : memref<16x1xf32, #tpu.memory_space<vmem>>, vector<16x1xf32>
    tpu.vector_store %arg7[%c0_13, %c0_14], %28 {strides = array<i32>} : memref<16x1xf32, #tpu.memory_space<vmem>>, vector<16x1xf32>,
    %c0_15 = arith.constant 0 : index
    %c0_16 = arith.constant 0 : index
    %30 = vector.load %arg6[%c0_15, %c0_16] : memref<16x1xf32, #tpu.memory_space<vmem>>, vector<16x1xf32>
    tpu.vector_store %arg6[%c0_15, %c0_16], %17 {strides = array<i32>} : memref<16x1xf32, #tpu.memory_space<vmem>>, vector<16x1xf32>,
    %c0_i32_17 = arith.constant 0 : i32
    %31 = arith.cmpi eq, %arg1, %c0_i32_17 : i32
    %32 = arith.extui %31 : i1 to i32
    %c0_i32_18 = arith.constant 0 : i32
    %33 = arith.cmpi ne, %32, %c0_i32_18 : i32
    scf.if %33 {
      %c0_19 = arith.constant 0 : index
      %c0_20 = arith.constant 0 : index
      %34 = vector.load %arg6[%c0_19, %c0_20] : memref<16x1xf32, #tpu.memory_space<vmem>>, vector<16x1xf32>
      %c0_21 = arith.constant 0 : index
      %c0_22 = arith.constant 0 : index
      %35 = vector.load %arg7[%c0_21, %c0_22] : memref<16x1xf32, #tpu.memory_space<vmem>>, vector<16x1xf32>
      %36 = math.log %35 : vector<16x1xf32>
      %37 = arith.addf %34, %36 : vector<16x1xf32>
      %c0_23 = arith.constant 0 : index
      %c0_24 = arith.constant 0 : index
      %38 = vector.load %arg3[%c0_23, %c0_24] : memref<16x1xf32, #tpu.memory_space<vmem>>, vector<16x1xf32>
      %39 = arith.subf %37, %38 : vector<16x1xf32>
      %c0_25 = arith.constant 0 : index
      %c0_26 = arith.constant 0 : index
      %40 = vector.load %arg5[%c0_25, %c0_26] : memref<16x1xf32, #tpu.memory_space<vmem>>, vector<16x1xf32>
      tpu.vector_store %arg5[%c0_25, %c0_26], %39 {strides = array<i32>} : memref<16x1xf32, #tpu.memory_space<vmem>>, vector<16x1xf32>,
    } else {
    }
    return
  }
  func.func @transform_0(%arg0: i32, %arg1: i32) -> (i32, i32) {
    %c0_i32 = arith.constant 0 : i32
    %c0_i32_0 = arith.constant 0 : i32
    return %arg0, %c0_i32 : i32, i32
  }
  func.func @transform_1(%arg0: i32, %arg1: i32) -> (i32, i32) {
    %c0_i32 = arith.constant 0 : i32
    %c0_i32_0 = arith.constant 0 : i32
    return %arg0, %c0_i32 : i32, i32
  }
  func.func @transform_2(%arg0: i32, %arg1: i32) -> (i32, i32) {
    %c0_i32 = arith.constant 0 : i32
    %c0_i32_0 = arith.constant 0 : i32
    return %arg1, %c0_i32 : i32, i32
  }
  func.func @transform_3(%arg0: i32, %arg1: i32) -> (i32, i32) {
    %c0_i32 = arith.constant 0 : i32
    %c0_i32_0 = arith.constant 0 : i32
    return %arg0, %c0_i32 : i32, i32
  }
}

</mosaic_0001>

<bundles_post_ra>
// kernel: tpu_custom_call.1
= control target key start
LH: loop header
LB: loop body
LE: loop exit
PB: predicated region body
PF: predicated region fallthrough
CT: control target
= control target key end

     0   :  { %vm89_vm0 = vcmask 261120   ;;  %v300_v0 = vmov 0.0   ;;  %vm301_vm1 = vmmov 0   ;;  %vm21_vm2 = vcmask 7168   ;;  %s390_s2 = inlined_call_operand.vmem [shape: bf16[128,32], index: 2, kind: input, shape index: {}]   ;;  %s391_s0 = inlined_call_operand.vmem [shape: bf16[16,32], index: 0, kind: input, shape index: {}]   ;;  %s392_s1 = inlined_call_operand.vmem [shape: f32[16,1], index: 1, kind: input, shape index: {}]   ;;  %s393_s3 = inlined_call_operand.vmem [shape: f32[16,1], index: 3, kind: output, shape index: {}]  }
   0x1   :  { %253 = vmatprep.subr.bf16.mxu0 %v300_v0  ;;  %v279_v1 = vld [vmem:[%s390_s2] sm:$0xff]   ;;  %269 = vmatprep.mubr.msk.bf16.mxu0 %vm301_vm1, %v300_v0  ;;  %v280_v3 = vld [vmem:[%s390_s2 + $0x8] sm:$0xff]   ;;  %v281_v5 = vld [vmem:[%s390_s2 + $0x10] sm:$0xff]   ;;  %v159_v20 = vlaneseq  ;;  %v302_v28 = vmov 0   ;;  %v303_v29 = vmov 1.0  }
   0x2   :  { %v94_v2 = vsel %vm89_vm0, %v279_v1, 0  ;;  %v97_v4 = vsel %vm89_vm0, %v280_v3, 0  ;;  %v100_v6 = vsel %vm89_vm0, %v281_v5, 0  ;;  %v282_v7 = vld [vmem:[%s390_s2 + $0x18] sm:$0xff]   ;;  %v283_v9 = vld [vmem:[%s390_s2 + $0x20] sm:$0xff]   ;;  %v284_v11 = vld [vmem:[%s390_s2 + $0x28] sm:$0xff]   ;;  %277 = vset.pattern.permute.xlu1 %v302_v28  ;;  %278 = vset.pattern.permute.xlu0 %v302_v28 }
   0x3   :  { %254 = vmatpush3.bf16.xpose.msra.mxu0 %v94_v2  ;;  %v103_v8 = vsel %vm89_vm0, %v282_v7, 0  ;;  %v106_v10 = vsel %vm89_vm0, %v283_v9, 0  ;;  %v109_v12 = vsel %vm89_vm0, %v284_v11, 0  ;;  %v285_v13 = vld [vmem:[%s390_s2 + $0x30] sm:$0xff]   ;;  %v286_v15 = vld [vmem:[%s390_s2 + $0x38] sm:$0xff]   ;;  %v287_v17 = vld [vmem:[%s391_s0] sm:$0xff]  }
   0x4   :  { %255 = vmatprep.subr.bf16.mxu0 %v300_v0  ;;  %v112_v14 = vsel %vm89_vm0, %v285_v13, 0  ;;  %v115_v16 = vsel %vm89_vm0, %v286_v15, 0  ;;  %v363_v18 = vld [vmem:[%s392_s1] sm:$0xff]  ;;  %v368_v19 = vld [vmem:[%s392_s1 + $0x8] sm:$0xff]  ;;  %v160_v21 = vand.u32 127, %v159_v20  ;;  %24 = vst.msk [vmem:[#allocation3] sm:$0xff] %vm21_vm2, %v303_v29 }
   0x5   :  { %22 = vst.msk [vmem:[#allocation2] sm:$0xff] %vm21_vm2, %v363_v18  ;;  %23 = vst.msk [vmem:[#allocation2 + $0x8] sm:$0xff] %vm21_vm2, %v368_v19 }
   0x6   :  { %vm163_vm3 = vcmp.lt.s32.totalorder %v160_v21, 20  ;;  %25 = vst.msk [vmem:[#allocation3 + $0x8] sm:$0xff] %vm21_vm2, %v303_v29 }
   0xb   :  { %256 = vmatpush3.bf16.xpose.msra.mxu0 %v97_v4  ;;  %v180_v49 = vld [vmem:[#allocation3] sm:$0xff] }
   0xc   :  { %257 = vmatprep.subr.bf16.mxu0 %v300_v0  ;;  %v166_v30 = vld [vmem:[#allocation2] sm:$0xff]  ;;  %v167_v33 = vld [vmem:[#allocation2 + $0x8] sm:$0xff] }
   0xd   :  { %v181_v53 = vld [vmem:[#allocation3 + $0x8] sm:$0xff] }
  0x13   :  { %258 = vmatpush3.bf16.xpose.msra.mxu0 %v100_v6 }
  0x14   :  { %259 = vmatprep.subr.bf16.mxu0 %v300_v0 }
  0x1b   :  { %260 = vmatpush3.bf16.xpose.msra.mxu0 %v103_v8 }
  0x1c   :  { %261 = vmatprep.subr.bf16.mxu0 %v300_v0 }
  0x23   :  { %262 = vmatpush3.bf16.xpose.msra.mxu0 %v106_v10 }
  0x24   :  { %263 = vmatprep.subr.bf16.mxu0 %v300_v0 }
  0x2b   :  { %264 = vmatpush3.bf16.xpose.msra.mxu0 %v109_v12 }
  0x2c   :  { %265 = vmatprep.subr.bf16.mxu0 %v300_v0 }
  0x33   :  { %266 = vmatpush3.bf16.xpose.msra.mxu0 %v112_v14 }
  0x34   :  { %267 = vmatprep.subr.bf16.mxu0 %v300_v0 }
  0x3b   :  { %268 = vmatpush3.bf16.xpose.msra.mxu0 %v115_v16 }
  0x42   :  { %270 = vmatmul.mubr.msk.bf16.vlgmr.msra.gmra.mrb[0].mxu0 %vm89_vm0, %v287_v17 }
 0x115   :  { %v151_v22 = vpop.f32.mrb[0].mxu0 }
 0x116   :  { %v271_v23 = vpop.f32.mrb[1].mxu0  ;;  %v164_v24 = vsel %vm163_vm3, %v151_v22, -1e+30 }
 0x117   :  { %168 = vmax.xlane.f32.xlu0 %v164_v24  ;;  %v154_v25 = vpop.f32.mrb[2].mxu0 }
 0x118   :  { %v272_v26 = vpop.f32.mrb[3].mxu0  ;;  %v165_v27 = vsel %vm163_vm3, %v154_v25, -1e+30 }
 0x11b   :  { %170 = vmax.xlane.f32.xlu0 %v165_v27 }
 0x1a4   :  { %v169_v31 = vpop.xlane.xlu0 %168 }
 0x1a5   :  { %v172_v32 = vmax.f32 %v166_v30, %v169_v31 }
 0x1a7   :  { %v174_v34 = vsub.f32 %v166_v30, %v172_v32  ;;  %209 = vst.msk [vmem:[#allocation2] sm:$0xff] %vm21_vm2, %v172_v32  ;;  %186 = vperm.xlu1 %277, %v172_v32  }
 0x1a8   :  { %v171_v35 = vpop.xlane.xlu0 %170 }
 0x1a9   :  { %v173_v36 = vmax.f32 %v167_v33, %v171_v35  ;;  %v176_v46 = vmul.f32 1.442695, %v174_v34 }
 0x1ab   :  { %v175_v37 = vsub.f32 %v167_v33, %v173_v36  ;;  %210 = vst.msk [vmem:[#allocation2 + $0x8] sm:$0xff] %vm21_vm2, %v173_v36  ;;  %191 = vperm.xlu1 %277, %v173_v36  }
 0x1ad   :  { %v178_v47 = vmul.f32 1.442695, %v175_v37 }
 0x1ae   :  { %v214_v62 = vld [vmem:[#allocation2] sm:$0xff] }
 0x1b2   :  { %v215_v3 = vld [vmem:[#allocation2 + $0x8] sm:$0xff] }
 0x226   :  { %v187_v38 = vpop.permute.xlu1 %186 }
 0x227   :  { %v194_v39 = vsub.f32 %v164_v24, %v187_v38 }
 0x229   :  { %v196_v40 = vmul.f32 1.442695, %v194_v39 }
 0x22a   :  { %v192_v41 = vpop.permute.xlu1 %191 }
 0x22b   :  { %288 = vpow2.f32 %v196_v40  ;;  %v195_v42 = vsub.f32 %v165_v27, %v192_v41 }
 0x22d   :  { %v198_v43 = vmul.f32 1.442695, %v195_v42 }
 0x22f   :  { %290 = vpow2.f32 %v198_v43 }
 0x230   :  { %292 = vpow2.f32 %v176_v46 }
 0x231   :  { %294 = vpow2.f32 %v178_v47 }
 0x235   :  { %v289_v44 = vpop.eup %288 }
 0x236   :  { %200 = vadd.xlane.f32.xlu0 %v289_v44 }
 0x239   :  { %v291_v45 = vpop.eup %290 }
 0x23a   :  { %202 = vadd.xlane.f32.xlu1 %v291_v45  ;;  %v293_v48 = vpop.eup %292 }
 0x23b   :  { %v182_v50 = vmul.f32 %v293_v48, %v180_v49  ;;  %v295_v51 = vpop.eup %294 }
 0x23c   :  { %v183_v55 = vmul.f32 %v295_v51, %v181_v53 }
 0x2c3   :  { %v201_v52 = vpop.xlane.xlu0 %200 }
 0x2c4   :  { %v204_v54 = vadd.f32 %v201_v52, %v182_v50 }
 0x2c6   :  { %207 = vst.msk [vmem:[#allocation3] sm:$0xff] %vm21_vm2, %v204_v54 }
 0x2c7   :  { %v203_v56 = vpop.xlane.xlu1 %202 }
 0x2c8   :  { %v205_v57 = vadd.f32 %v203_v56, %v183_v55 }
 0x2ca   :  { %208 = vst.msk [vmem:[#allocation3 + $0x8] sm:$0xff] %vm21_vm2, %v205_v57 }
 0x2cd   :  { %v216_v58 = vld [vmem:[#allocation3] sm:$0xff] }
 0x2ce   :  { %296 = vlog2.f32 %v216_v58 }
 0x2d1   :  { %v217_v59 = vld [vmem:[#allocation3 + $0x8] sm:$0xff] }
 0x2d2   :  { %298 = vlog2.f32 %v217_v59 }
 0x2d8   :  { %v297_v60 = vpop.eup %296 }
 0x2d9   :  { %v219_v61 = vmul.f32 0.6931472, %v297_v60 }
 0x2db   :  { %v222_v63 = vadd.f32 %v219_v61, %v214_v62 }
 0x2dc   :  { %v299_v0 = vpop.eup %298 }
 0x2dd   :  { %v226_v1 = vsub.f32 %v222_v63, %v363_v18  ;;  %v221_v2 = vmul.f32 0.6931472, %v299_v0 }
 0x2df   :  { %228 = vst.msk [vmem:[%s393_s3] sm:$0xff] %vm21_vm2, %v226_v1  ;;  %v223_v4 = vadd.f32 %v221_v2, %v215_v3 }
 0x2e1   :  { %v227_v5 = vsub.f32 %v223_v4, %v368_v19 }
 0x2e3   :  { %229 = vst.msk [vmem:[%s393_s3 + $0x8] sm:$0xff] %vm21_vm2, %v227_v5 }

</bundles_post_ra>
